<compile_context>
chip_gen: v6e
topology: v6e:2x2x1
jax: 0.10.0
libtpu: 0.0.40
codegen_flags: <defaults>
</compile_context>

<pallas_src>
import jax
import jax.numpy as jnp
from jax.experimental import pallas as pl
from jax.experimental.pallas import tpu as pltpu


# ----------------------------------------------------------------------------
# Pallas kernel: Y = X @ W + b  on a (tm, K) x (K, E) tile, f32 accumulation.
# ----------------------------------------------------------------------------

def _patch_embed_matmul_kernel(x_ref, w_ref, b_ref, o_ref):
    # x_ref: (tm, K) bf16 | w_ref: (K, E) bf16 | b_ref: (1, E) f32 | o_ref: (tm, E) f32
    y = jnp.dot(x_ref[...], w_ref[...], preferred_element_type=jnp.float32)
    o_ref[...] = (y + b_ref[...]).astype(o_ref.dtype)


def _round_up(x, m):
    return (x + m - 1) // m * m


# ----------------------------------------------------------------------------
# Wrapper: PatchEmbedding.forward
#   x: (B, C, H, W)  ->  (B, num_patches, embed_dim)
# ----------------------------------------------------------------------------

def patch_embedding_forward(x_nchw, w_oihw, bias, patch_size, *, tm=512):
    B, C, H, W = x_nchw.shape
    E = w_oihw.shape[0]
    p = patch_size
    Hp, Wp = H // p, W // p
    num_patches = Hp * Wp

    # Non-overlapping patch extraction == pure relayout (layout glue, no FLOPs,
    # no data inflation). K ordered as (C, ky, kx) to match Conv2d weight (E,C,p,p).
    patches = x_nchw.reshape(B, C, Hp, p, Wp, p)
    patches = patches.transpose(0, 2, 4, 1, 3, 5).reshape(B * num_patches, C * p * p)

    M, K = patches.shape

    # Tile M explicitly: tm multiple of 8 (sublane), pad M up to a tile multiple.
    tm_eff = max(8, min(tm, _round_up(M, 8)))
    M_pad = _round_up(M, tm_eff)
    if M_pad != M:
        patches = jnp.pad(patches, ((0, M_pad - M), (0, 0)))

    # Keep the output lane-dense: pad E up to a multiple of 128 if needed so the
    # kernel's stores are unmasked vst's (un-padded afterwards in the wrapper).
    E_pad = _round_up(E, 128)

    # bf16 MXU operands; bias / accumulation / output stay f32.
    x_bf16 = patches.astype(jnp.bfloat16)
    w_mat = w_oihw.reshape(E, C * p * p).T.astype(jnp.bfloat16)   # (K, E)
    b_row = bias.reshape(1, E).astype(jnp.float32)
    if E_pad != E:
        w_mat = jnp.pad(w_mat, ((0, 0), (0, E_pad - E)))
        b_row = jnp.pad(b_row, ((0, 0), (0, E_pad - E)))

    grid = (M_pad // tm_eff,)
    out = pl.pallas_call(
        _patch_embed_matmul_kernel,
        out_shape=jax.ShapeDtypeStruct((M_pad, E_pad), jnp.float32),
        grid_spec=pltpu.PrefetchScalarGridSpec(
            num_scalar_prefetch=0,
            grid=grid,
            in_specs=[
                pl.BlockSpec((tm_eff, K), lambda i: (i, 0)),      # patch-row tile
                pl.BlockSpec((K, E_pad), lambda i: (0, 0)),       # weights, resident
                pl.BlockSpec((1, E_pad), lambda i: (0, 0)),       # bias, resident
            ],
            out_specs=pl.BlockSpec((tm_eff, E_pad), lambda i: (i, 0)),
        ),
        compiler_params=pltpu.CompilerParams(
            dimension_semantics=("parallel",),
            vmem_limit_bytes=64 * 1024 * 1024,
        ),
    )(x_bf16, w_mat, b_row)

    return out[:M, :E].reshape(B, num_patches, E)


# ----------------------------------------------------------------------------
# Plain-JAX reference (f32) for validation
# ----------------------------------------------------------------------------

def _reference_forward(x_nchw, w_oihw, bias, p):
    y = jax.lax.conv_general_dilated(
        x_nchw, w_oihw, window_strides=(p, p), padding="VALID",
        dimension_numbers=("NCHW", "OIHW", "NCHW"))
    y = y + bias.reshape(1, -1, 1, 1)
    B, E, Hp, Wp = y.shape
    return y.reshape(B, E, Hp * Wp).transpose(0, 2, 1)


# ----------------------------------------------------------------------------
# Deterministic parameter init (PyTorch-like uniform fan-in scaling)
# ----------------------------------------------------------------------------

def init_params(key, in_channels, embed_dim, patch_size):
    kw, kb = jax.random.split(key)
    fan_in = in_channels * patch_size * patch_size
    scale = 1.0 / float(fan_in) ** 0.5
    w = jax.random.uniform(kw, (embed_dim, in_channels, patch_size, patch_size),
                           jnp.float32, -scale, scale)
    b = jax.random.uniform(kb, (embed_dim,), jnp.float32, -scale, scale)
    return w, b


# ----------------------------------------------------------------------------

if __name__ == "__main__":
    key = jax.random.PRNGKey(0)
    pkey, dkey = jax.random.split(key)

    # Small shapes consistent with the module: img 16x16, patch 4, C=4, E=128
    # (E=128 keeps the output lane-dense on the 128-lane axis).
    B, C, H, W = 2, 4, 16, 16
    patch_size = 4
    embed_dim = 128
    num_patches = (H // patch_size) * (W // patch_size)

    w, b = init_params(pkey, C, embed_dim, patch_size)
    x = jax.random.normal(dkey, (B, C, H, W), jnp.float32)

    fwd = jax.jit(lambda xx: patch_embedding_forward(xx, w, b, patch_size))
    out = fwd(x)
    jax.block_until_ready(out)

    assert out.shape == (B, num_patches, embed_dim), out.shape
    assert bool(jnp.all(jnp.isfinite(out)))

    ref = _reference_forward(x, w, b, patch_size)
    # bf16 MXU operands (f32 accumulation) -> loose tolerance vs f32 reference.
    max_err = float(jnp.max(jnp.abs(out - ref)))
    assert max_err < 5e-2, f"max abs err {max_err}"

    print("KERNEL_OK")
</pallas_src>

<mosaic_0001>
module attributes {stable_mosaic.version = 11 : i64} {
  func.func @_patch_embed_matmul_kernel(%arg0: i32, %arg1: memref<32x64xbf16, #tpu.memory_space<vmem>>, %arg2: memref<64x128xbf16, #tpu.memory_space<vmem>>, %arg3: memref<1x128xf32, #tpu.memory_space<vmem>>, %arg4: memref<32x128xf32, #tpu.memory_space<vmem>>) attributes {dimension_semantics = [#tpu.dimension_semantics<parallel>], iteration_bounds = array<i64: 1>, scalar_prefetch = 0 : i64, scratch_operands = 0 : i64, tpu.core_type = #tpu.core_type<tc>, window_params = [{transform_indices = @transform_0, window_bounds = array<i64: 32, 64>}, {pipeline_mode = #tpu.pipeline_mode<synchronous>, transform_indices = @transform_1, window_bounds = array<i64: 64, 128>}, {pipeline_mode = #tpu.pipeline_mode<synchronous>, transform_indices = @transform_2, window_bounds = array<i64: 1, 128>}, {transform_indices = @transform_3, window_bounds = array<i64: 32, 128>}]} {
    %c0 = arith.constant 0 : index
    %c0_0 = arith.constant 0 : index
    %0 = vector.load %arg1[%c0, %c0_0] : memref<32x64xbf16, #tpu.memory_space<vmem>>, vector<32x64xbf16>
    %c0_1 = arith.constant 0 : index
    %c0_2 = arith.constant 0 : index
    %1 = vector.load %arg2[%c0_1, %c0_2] : memref<64x128xbf16, #tpu.memory_space<vmem>>, vector<64x128xbf16>
    %cst = arith.constant dense<0.000000e+00> : vector<32x128xf32>
    %2 = tpu.matmul %0, %1, %cst {dimension_numbers = #tpu.dot_dimension_numbers<[1], [0], [0], [1], [0, 0, 1, 1], [], []>} : vector<32x64xbf16>, vector<64x128xbf16>, vector<32x128xf32> -> vector<32x128xf32>
    %c0_3 = arith.constant 0 : index
    %c0_4 = arith.constant 0 : index
    %3 = vector.load %arg3[%c0_3, %c0_4] : memref<1x128xf32, #tpu.memory_space<vmem>>, vector<1x128xf32>
    %4 = vector.broadcast %3 : vector<1x128xf32> to vector<32x128xf32>
    %5 = arith.addf %2, %4 : vector<32x128xf32>
    %c0_5 = arith.constant 0 : index
    %c0_6 = arith.constant 0 : index
    %6 = vector.load %arg4[%c0_5, %c0_6] : memref<32x128xf32, #tpu.memory_space<vmem>>, vector<32x128xf32>
    tpu.vector_store %arg4[%c0_5, %c0_6], %5 {strides = array<i32>} : memref<32x128xf32, #tpu.memory_space<vmem>>, vector<32x128xf32>,
    return
  }
  func.func @transform_0(%arg0: i32) -> (i32, i32) {
    %c0_i32 = arith.constant 0 : i32
    %c0_i32_0 = arith.constant 0 : i32
    return %arg0, %c0_i32 : i32, i32
  }
  func.func @transform_1(%arg0: i32) -> (i32, i32) {
    %c0_i32 = arith.constant 0 : i32
    %c0_i32_0 = arith.constant 0 : i32
    %c0_i32_1 = arith.constant 0 : i32
    return %c0_i32, %c0_i32_0 : i32, i32
  }
  func.func @transform_2(%arg0: i32) -> (i32, i32) {
    %c0_i32 = arith.constant 0 : i32
    %c0_i32_0 = arith.constant 0 : i32
    %c0_i32_1 = arith.constant 0 : i32
    return %c0_i32, %c0_i32_0 : i32, i32
  }
  func.func @transform_3(%arg0: i32) -> (i32, i32) {
    %c0_i32 = arith.constant 0 : i32
    %c0_i32_0 = arith.constant 0 : i32
    return %arg0, %c0_i32 : i32, i32
  }
}

</mosaic_0001>

<bundles_post_ra>
// kernel: _lambda_.1
= control target key start
LH: loop header
LB: loop body
LE: loop exit
PB: predicated region body
PF: predicated region fallthrough
CT: control target
= control target key end

     0   :  { %vm69_vm0 = vcmask 523264   ;;  %s250_s0 = inlined_call_operand.vmem [shape: bf16[32,64], index: 0, kind: input, shape index: {}]   ;;  %s251_s1 = inlined_call_operand.vmem [shape: bf16[64,128], index: 1, kind: input, shape index: {}]   ;;  %s252_s2 = inlined_call_operand.vmem [shape: f32[1,128], index: 2, kind: input, shape index: {}]   ;;  %s253_s3 = inlined_call_operand.hbm [shape: f32[32,128], index: 3, kind: output, shape index: {}]  }
   0x1   :  { %v175_v0 = vld [vmem:[%s251_s1 + $0x18] sm:$0xff]   ;;  %v176_v1 = vld [vmem:[%s251_s1 + $0x10] sm:$0xff]   ;;  %v177_v2 = vld [vmem:[%s251_s1 + $0x8] sm:$0xff]  }
   0x2   :  { %160 = vmatprep.subr.bf16.mxu0 %v175_v0  ;;  %v179_v3 = vld [vmem:[%s250_s0] sm:$0xff]  }
   0x3   :  { %161 = vmatpush3.bf16.msra.mxu0 %v175_v0  ;;  %168 = vmatprep.mubr.msk.bf16.mxu0 %vm69_vm0, %v179_v3 }
   0x4   :  { %162 = vmatprep.subr.bf16.mxu0 %v176_v1 }
   0x5   :  { %8 = vsyncpa [#allocation3], 0  ;;  %v178_v4 = vld [vmem:[%s251_s1] sm:$0xff]   ;;  %v180_v5 = vld [vmem:[%s250_s0 + $0x8] sm:$0xff]   ;;  %s203_s26 = smov [#allocation2]  }
   0x6   :  { %v145_v6 = vld [vmem:[%s252_s2] ss:$0 sm:$0xff]  ;;  %s134_s27 = sshll.u32 %s203_s26, 4  ;;  %s135_s27 = int_to_ptr.vmem [resolvable:$true] %s134_s27 }
   0x7   :  { %163 = vmatpush3.bf16.msra.mxu0 %v176_v1  ;;  %s181_s0 = scalar_lea.vmem %s135_s27, 512  ;;  %p186_p1 = scmp.lt.s32.totalorder %s135_s27, %s135_s27 }
   0x8   :  { %164 = vmatprep.subr.bf16.mxu0 %v177_v2  ;;  %p182_p0 = scmp.ne.s32.totalorder %s135_s27, %s181_s0  ;;  %p187_p2 = scmp.lt.s32.totalorder %s181_s0, %s181_s0 }
   0xa   :  { %p188_p3 = por %p187_p2, %p186_p1 }
   0xb   :  { %165 = vmatpush3.bf16.msra.mxu0 %v177_v2 }
   0xc   :  { %166 = vmatprep.subr.bf16.mxu0 %v178_v4  ;;  %p189_p4 = pnand %p188_p3, %p182_p0 }
   0xf   :  { %167 = vmatpush3.bf16.msra.mxu0 %v178_v4 }
  0x12   :  { %169 = vmatmul.mubr.msk.bf16.vlgmr.msra.gmra.mxu0 %vm69_vm0, %v180_v5 }
  0xd2   :  { %v170_v7 = vpop.f32.mrf.mxu0 }
  0xd3   :  { %v119_v8 = vadd.f32 %v170_v7, %v145_v6 }
  0xd4   :  { %v110_v9 = vpop.f32.mrf.mxu0 }
  0xd5   :  { %127 = vst [vmem:[#allocation2 + $0x10] sm:$0xff] %v119_v8  ;;  %v111_v10 = vadd.f32 %v145_v6, %v110_v9 }
  0xd6   :  { %v171_v11 = vpop.f32.mrf.mxu0 }
  0xd7   :  { %125 = vst [vmem:[#allocation2] sm:$0xff] %v111_v10  ;;  %v122_v12 = vadd.f32 %v171_v11, %v145_v6 }
  0xd8   :  { %v113_v13 = vpop.f32.mrf.mxu0 }
  0xd9   :  { %128 = vst [vmem:[#allocation2 + $0x18] sm:$0xff] %v122_v12  ;;  %v114_v14 = vadd.f32 %v145_v6, %v113_v13 }
  0xdb   :  { %126 = vst [vmem:[#allocation2 + $0x8] sm:$0xff] %v114_v14 }
  0xdc   :  { %192 = shalt.err (!%p189_p4)
}
  0xdd   :  { %s204_s1 = smov 128   ;;  %s205_s2 = smov 8  }
  0xde   :  { %140 = dma.vmem_to_hbm [thread:$0]  %s135_s27, 512, %s253_s3, [#allocation3], %s204_s1, %s204_s1, %s205_s2  }
  0xdf   :  { %201 = dma.done.wait [#allocation3], 512  }
  0xe0   :  { %202 = vsyncadd [#allocation3], 4294966784 }
  0xe1   :  { %144 = vsyncpa [#allocation3], 1 }

</bundles_post_ra>
